<compile_context>
chip_gen: v7x
topology: tpu7x:2x2x1
jax: 0.10.0
libtpu: 0.0.40
codegen_flags: <defaults>
</compile_context>

<pallas_src>
import jax
import jax.numpy as jnp
from jax.experimental import pallas as pl
from jax.experimental.pallas import tpu as pltpu


# ---------------- config (small, consistent with the module) ----------------
BATCH = 2            # batch size
REVIEW_LEN = 16      # config.review_length  (L)
WORD_DIM = 32        # word_dim              (D, conv in_channels)
KERNEL_COUNT = 64    # config.kernel_count   (C, conv out_channels)
KERNEL_SIZE = 3      # config.kernel_size    (K, odd -> 'same' length)
CNN_OUT_DIM = 32     # config.cnn_out_dim    (O)
REVIEW_COUNT = 1     # review_count (kernel assumes 1)

PAD = (KERNEL_SIZE - 1) // 2


def _cnn_kernel(x_ref, wc_ref, bc_ref, wl_ref, bl_ref, out_ref):
    """Whole forward pass in a single invocation.

    x_ref  : (B, L, D)   raw input (batch, review_length, word_dim)
    wc_ref : (K, D, C)   conv weight, per-tap (in_channel, out_channel)
    bc_ref : (1, C)      conv bias
    wl_ref : (C, O)      linear weight (torch (O, C) transposed)
    bl_ref : (1, O)      linear bias
    out_ref: (B, O)
    """
    BL = BATCH * REVIEW_LEN
    # (B, L, D) -> (B*L, D).  L = 16 is a multiple of 8 sublanes, so this is a free view.
    x = x_ref[...].reshape(BL, WORD_DIM)

    # Per-row position within its review; masks both the 'same'-padding boundary and
    # cross-batch leakage on the flattened B*L axis.
    t = jax.lax.broadcasted_iota(jnp.int32, (BL, 1), 0) % REVIEW_LEN

    # Conv1d (padding = (K-1)//2) as K accumulated MXU matmuls; off-center taps are
    # realigned with a sublane roll (XLU) and their invalid rows zeroed.
    acc = jnp.zeros((BL, KERNEL_COUNT), jnp.float32)
    for k in range(KERNEL_SIZE):
        off = k - PAD                                                     # -PAD .. +PAD
        y = jnp.dot(x, wc_ref[k], preferred_element_type=jnp.float32)     # (B*L, C)
        if off != 0:
            # Row r of the rolled result holds source row r + off.
            y = pltpu.roll(y, shift=(-off) % BL, axis=0)
            if off < 0:
                y = jnp.where(t < -off, 0.0, y)                 # t + off < 0  -> padded zero
            else:
                y = jnp.where(t >= REVIEW_LEN - off, 0.0, y)    # t + off >= L -> padded zero
        acc = acc + y

    conv = jnp.maximum(acc + bc_ref[...], 0.0)                            # bias + ReLU

    # MaxPool2d(kernel_size=(1, review_length)) == max over the length axis per batch row.
    pooled = jnp.max(conv.reshape(BATCH, REVIEW_LEN, KERNEL_COUNT), axis=1)   # (B, C)

    # Linear + Tanh, single store of the whole (B, O) result.
    lin = jnp.dot(pooled, wl_ref[...], preferred_element_type=jnp.float32) + bl_ref[...]
    out_ref[...] = jnp.tanh(lin)


def prepare_params(w_conv, b_conv, w_lin, b_lin):
    """One-time weight re-layout (parameter-load time, NOT per forward call).

    torch layouts in:  w_conv (C, D, K), b_conv (C,), w_lin (O, C*review_count), b_lin (O,)
    kernel layouts out: (K, D, C), (1, C), (C, O), (1, O)
    """
    wc = jnp.transpose(w_conv, (2, 1, 0))                # (K, D, C)
    bc = b_conv.reshape(1, KERNEL_COUNT)                 # (1, C)
    wl = jnp.transpose(w_lin, (1, 0))                    # (C, O)
    bl = b_lin.reshape(1, CNN_OUT_DIM)                   # (1, O)
    return wc, bc, wl, bl


@jax.jit
def cnn_forward(x, wc, bc, wl, bl):
    """x: (B, L, D) float32; weights already in kernel layout.  Returns (B, O) float32."""
    B, L, D = x.shape
    assert B == BATCH and L == REVIEW_LEN and D == WORD_DIM
    assert REVIEW_COUNT == 1, "kernel assumes review_count == 1 (as in the torch default)"
    return pl.pallas_call(
        _cnn_kernel,
        out_shape=jax.ShapeDtypeStruct((BATCH, CNN_OUT_DIM), jnp.float32),
        in_specs=[pl.BlockSpec(memory_space=pltpu.MemorySpace.VMEM)] * 5,
        out_specs=pl.BlockSpec(memory_space=pltpu.MemorySpace.VMEM),
    )(x, wc, bc, wl, bl)


def _reference(x, w_conv, b_conv, w_lin, b_lin):
    """Pure-JAX reference mirroring the torch forward (for a sanity check)."""
    x_pad = jnp.pad(x, ((0, 0), (PAD, PAD), (0, 0)))                      # (B, L+2*PAD, D)
    conv = jnp.zeros((x.shape[0], REVIEW_LEN, KERNEL_COUNT), jnp.float32)
    for k in range(KERNEL_SIZE):
        conv = conv + jnp.einsum(
            "btd,cd->btc", x_pad[:, k:k + REVIEW_LEN, :], w_conv[:, :, k]
        )
    conv = jnp.maximum(conv + b_conv[None, None, :], 0.0)
    pooled = jnp.max(conv, axis=1)                                        # (B, C)
    return jnp.tanh(pooled @ w_lin.T + b_lin[None, :])


if __name__ == "__main__":
    key = jax.random.PRNGKey(0)
    k_x, k_wc, k_bc, k_wl, k_bl = jax.random.split(key, 5)

    x = jax.random.normal(k_x, (BATCH, REVIEW_LEN, WORD_DIM), dtype=jnp.float32)

    # Deterministic parameter init (shapes match the torch layers).
    w_conv = 0.1 * jax.random.normal(k_wc, (KERNEL_COUNT, WORD_DIM, KERNEL_SIZE), jnp.float32)
    b_conv = 0.1 * jax.random.normal(k_bc, (KERNEL_COUNT,), jnp.float32)
    w_lin = 0.1 * jax.random.normal(k_wl, (CNN_OUT_DIM, KERNEL_COUNT * REVIEW_COUNT), jnp.float32)
    b_lin = 0.1 * jax.random.normal(k_bl, (CNN_OUT_DIM,), jnp.float32)

    # One-time weight re-layout (kept outside the per-call forward).
    wc, bc, wl, bl = prepare_params(w_conv, b_conv, w_lin, b_lin)
    wc, bc, wl, bl = jax.block_until_ready((wc, bc, wl, bl))

    out = jax.block_until_ready(cnn_forward(x, wc, bc, wl, bl))

    ref = _reference(x, w_conv, b_conv, w_lin, b_lin)
    assert out.shape == (BATCH, CNN_OUT_DIM)
    assert jnp.allclose(out, ref, atol=1e-5, rtol=1e-5), "mismatch vs reference"

    print("KERNEL_OK")
</pallas_src>

<mosaic_0001>
module attributes {stable_mosaic.version = 11 : i64} {
  func.func @_cnn_kernel(%arg0: memref<2x16x32xf32, #tpu.memory_space<vmem>>, %arg1: memref<3x32x64xf32, #tpu.memory_space<vmem>>, %arg2: memref<1x64xf32, #tpu.memory_space<vmem>>, %arg3: memref<64x32xf32, #tpu.memory_space<vmem>>, %arg4: memref<1x32xf32, #tpu.memory_space<vmem>>, %arg5: memref<2x32xf32, #tpu.memory_space<vmem>>) attributes {dimension_semantics = [], scalar_prefetch = 0 : i64, scratch_operands = 0 : i64, tpu.core_type = #tpu.core_type<tc>} {
    %c0 = arith.constant 0 : index
    %c0_0 = arith.constant 0 : index
    %c0_1 = arith.constant 0 : index
    %0 = vector.load %arg0[%c0, %c0_0, %c0_1] : memref<2x16x32xf32, #tpu.memory_space<vmem>>, vector<2x16x32xf32>
    %1 = vector.shape_cast %0 : vector<2x16x32xf32> to vector<32x32xf32>
    %2 = tpu.iota {dimensions = array<i32: 0>} : vector<32x1xi32>
    %c16_i32 = arith.constant 16 : i32
    %c0_i32 = arith.constant 0 : i32
    %3 = arith.cmpi eq, %c16_i32, %c0_i32 : i32
    %c1_i32 = arith.constant 1 : i32
    %4 = arith.select %3, %c1_i32, %c16_i32 : i32
    %5 = vector.broadcast %4 : i32 to vector<32x1xi32>
    %6 = arith.remsi %2, %5 : vector<32x1xi32>
    %c0_i32_2 = arith.constant 0 : i32
    %7 = vector.broadcast %c0_i32_2 : i32 to vector<32x1xi32>
    %8 = arith.cmpi ne, %6, %7 : vector<32x1xi32>
    %c0_i32_3 = arith.constant 0 : i32
    %9 = vector.broadcast %c0_i32_3 : i32 to vector<32x1xi32>
    %10 = arith.cmpi slt, %6, %9 : vector<32x1xi32>
    %c0_i32_4 = arith.constant 0 : i32
    %11 = arith.cmpi slt, %4, %c0_i32_4 : i32
    %12 = vector.broadcast %11 : i1 to vector<32x1xi1>
    %13 = vector.broadcast %12 : vector<32x1xi1> to vector<32x1xi1>
    %14 = arith.xori %10, %13 : vector<32x1xi1>
    %15 = arith.andi %14, %8 : vector<32x1xi1>
    %16 = vector.broadcast %4 : i32 to vector<32x1xi32>
    %17 = arith.addi %6, %16 : vector<32x1xi32>
    %18 = arith.select %15, %17, %6 : vector<32x1xi1>, vector<32x1xi32>
    %cst = arith.constant 0.000000e+00 : f32
    %19 = vector.broadcast %cst : f32 to vector<32x64xf32>
    %c0_5 = arith.constant 0 : index
    %c0_6 = arith.constant 0 : index
    %c0_7 = arith.constant 0 : index
    %20 = vector.load %arg1[%c0_5, %c0_6, %c0_7] : memref<3x32x64xf32, #tpu.memory_space<vmem>>, vector<1x32x64xf32>
    %21 = vector.shape_cast %20 : vector<1x32x64xf32> to vector<32x64xf32>
    %cst_8 = arith.constant dense<0.000000e+00> : vector<32x64xf32>
    %22 = tpu.matmul %1, %21, %cst_8 {dimension_numbers = #tpu.dot_dimension_numbers<[1], [0], [0], [1], [0, 0, 1, 1], [], []>} : vector<32x32xf32>, vector<32x64xf32>, vector<32x64xf32> -> vector<32x64xf32>
    %c1_i32_9 = arith.constant 1 : i32
    %23 = tpu.dynamic_rotate %22 by %c1_i32_9 dim 0 : vector<32x64xf32>, i32 -> vector<32x64xf32>
    %c1_i32_10 = arith.constant 1 : i32
    %24 = vector.broadcast %c1_i32_10 : i32 to vector<32x1xi32>
    %25 = arith.cmpi slt, %18, %24 : vector<32x1xi32>
    %cst_11 = arith.constant 0.000000e+00 : f32
    %26 = vector.shape_cast %25 : vector<32x1xi1> to vector<32x1xi1>
    %27 = vector.broadcast %26 : vector<32x1xi1> to vector<32x64xi1>
    %28 = vector.broadcast %cst_11 : f32 to vector<32x64xf32>
    %29 = arith.select %27, %28, %23 : vector<32x64xi1>, vector<32x64xf32>
    %30 = arith.addf %19, %29 : vector<32x64xf32>
    %c1 = arith.constant 1 : index
    %c0_12 = arith.constant 0 : index
    %c0_13 = arith.constant 0 : index
    %31 = vector.load %arg1[%c1, %c0_12, %c0_13] : memref<3x32x64xf32, #tpu.memory_space<vmem>>, vector<1x32x64xf32>
    %32 = vector.shape_cast %31 : vector<1x32x64xf32> to vector<32x64xf32>
    %cst_14 = arith.constant dense<0.000000e+00> : vector<32x64xf32>
    %33 = tpu.matmul %1, %32, %cst_14 {dimension_numbers = #tpu.dot_dimension_numbers<[1], [0], [0], [1], [0, 0, 1, 1], [], []>} : vector<32x32xf32>, vector<32x64xf32>, vector<32x64xf32> -> vector<32x64xf32>
    %34 = arith.addf %30, %33 : vector<32x64xf32>
    %c2 = arith.constant 2 : index
    %c0_15 = arith.constant 0 : index
    %c0_16 = arith.constant 0 : index
    %35 = vector.load %arg1[%c2, %c0_15, %c0_16] : memref<3x32x64xf32, #tpu.memory_space<vmem>>, vector<1x32x64xf32>
    %36 = vector.shape_cast %35 : vector<1x32x64xf32> to vector<32x64xf32>
    %cst_17 = arith.constant dense<0.000000e+00> : vector<32x64xf32>
    %37 = tpu.matmul %1, %36, %cst_17 {dimension_numbers = #tpu.dot_dimension_numbers<[1], [0], [0], [1], [0, 0, 1, 1], [], []>} : vector<32x32xf32>, vector<32x64xf32>, vector<32x64xf32> -> vector<32x64xf32>
    %c31_i32 = arith.constant 31 : i32
    %38 = tpu.dynamic_rotate %37 by %c31_i32 dim 0 : vector<32x64xf32>, i32 -> vector<32x64xf32>
    %c15_i32 = arith.constant 15 : i32
    %39 = vector.broadcast %c15_i32 : i32 to vector<32x1xi32>
    %40 = arith.cmpi sge, %18, %39 : vector<32x1xi32>
    %cst_18 = arith.constant 0.000000e+00 : f32
    %41 = vector.shape_cast %40 : vector<32x1xi1> to vector<32x1xi1>
    %42 = vector.broadcast %41 : vector<32x1xi1> to vector<32x64xi1>
    %43 = vector.broadcast %cst_18 : f32 to vector<32x64xf32>
    %44 = arith.select %42, %43, %38 : vector<32x64xi1>, vector<32x64xf32>
    %45 = arith.addf %34, %44 : vector<32x64xf32>
    %c0_19 = arith.constant 0 : index
    %c0_20 = arith.constant 0 : index
    %46 = vector.load %arg2[%c0_19, %c0_20] : memref<1x64xf32, #tpu.memory_space<vmem>>, vector<1x64xf32>
    %47 = vector.broadcast %46 : vector<1x64xf32> to vector<32x64xf32>
    %48 = arith.addf %45, %47 : vector<32x64xf32>
    %cst_21 = arith.constant 0.000000e+00 : f32
    %49 = vector.broadcast %cst_21 : f32 to vector<32x64xf32>
    %50 = arith.maximumf %48, %49 : vector<32x64xf32>
    %51 = vector.shape_cast %50 : vector<32x64xf32> to vector<2x16x64xf32>
    %cst_22 = arith.constant dense<0xFF800000> : vector<2x64xf32>
    %52 = vector.multi_reduction <maximumf>, %51, %cst_22 [1] : vector<2x16x64xf32> to vector<2x64xf32>
    %c0_23 = arith.constant 0 : index
    %c0_24 = arith.constant 0 : index
    %53 = vector.load %arg3[%c0_23, %c0_24] : memref<64x32xf32, #tpu.memory_space<vmem>>, vector<64x32xf32>
    %cst_25 = arith.constant dense<0.000000e+00> : vector<2x32xf32>
    %54 = tpu.matmul %52, %53, %cst_25 {dimension_numbers = #tpu.dot_dimension_numbers<[1], [0], [0], [1], [0, 0, 1, 1], [], []>} : vector<2x64xf32>, vector<64x32xf32>, vector<2x32xf32> -> vector<2x32xf32>
    %c0_26 = arith.constant 0 : index
    %c0_27 = arith.constant 0 : index
    %55 = vector.load %arg4[%c0_26, %c0_27] : memref<1x32xf32, #tpu.memory_space<vmem>>, vector<1x32xf32>
    %56 = vector.broadcast %55 : vector<1x32xf32> to vector<2x32xf32>
    %57 = arith.addf %54, %56 : vector<2x32xf32>
    %58 = math.tanh %57 : vector<2x32xf32>
    %c0_28 = arith.constant 0 : index
    %c0_29 = arith.constant 0 : index
    %59 = vector.load %arg5[%c0_28, %c0_29] : memref<2x32xf32, #tpu.memory_space<vmem>>, vector<2x32xf32>
    tpu.vector_store %arg5[%c0_28, %c0_29], %58 {strides = array<i32>} : memref<2x32xf32, #tpu.memory_space<vmem>>, vector<2x32xf32>,
    return
  }
}

</mosaic_0001>

<bundles_post_ra>
// kernel: cnn_forward.1
= control target key start
LH: loop header
LB: loop body
LE: loop exit
PB: predicated region body
PF: predicated region fallthrough
CT: control target
= control target key end

     0   :  { %10 = vsyncpa [#allocation3], 0  ;;  %s941_s0 = inlined_call_operand.hbm [shape: f32[2,16,32], index: 0, kind: input, shape index: {}]   ;;  %s942_s1 = inlined_call_operand.vmem [shape: f32[3,32,64], index: 1, kind: input, shape index: {}]   ;;  %s943_s2 = inlined_call_operand.vmem [shape: f32[1,64], index: 2, kind: input, shape index: {}]   ;;  %s944_s3 = inlined_call_operand.vmem [shape: f32[64,32], index: 3, kind: input, shape index: {}]   ;;  %s945_s4 = inlined_call_operand.vmem [shape: f32[1,32], index: 4, kind: input, shape index: {}]   ;;  %s946_s5 = inlined_call_operand.hbm [shape: f32[2,32], index: 5, kind: output, shape index: {}]  }
   0x1   :  { %11 = vsyncpa [#allocation4], 0  ;;  %s789_s18 = smov [#allocation2]   ;;  %s741_s22 = scalar_lea.hbm %s941_s0, 512 }
   0x2   :  { %s17_s19 = sshll.u32 %s789_s18, 4  ;;  %p742_p0 = scmp.ne.s32.totalorder %s941_s0, %s741_s22  ;;  %s18_s19 = int_to_ptr.vmem [resolvable:$true] %s17_s19 }
   0x3   :  { %p745_p1 = scmp.lt.u32.totalorder %s741_s22, %s941_s0 }
   0x5   :  { %p747_p2 = pnand %p745_p1, %p742_p0 }
   0x7   :  { %750 = shalt.err (!%p747_p2)
}
   0x8   :  { %s751_s27 = scalar_lea.vmem %s18_s19, 512  ;;  %p756_p4 = scmp.lt.s32.totalorder %s18_s19, %s18_s19 }
   0x9   :  { %p752_p3 = scmp.ne.s32.totalorder %s18_s19, %s751_s27  ;;  %p757_p5 = scmp.lt.s32.totalorder %s751_s27, %s751_s27 }
   0xb   :  { %p758_p6 = por %p757_p5, %p756_p4 }
   0xd   :  { %p759_p7 = pnand %p758_p6, %p752_p3 }
   0xf   :  { %762 = shalt.err (!%p759_p7)
}
  0x10   :  { %s790_s28 = smov 128   ;;  %s791_s29 = smov 8  }
  0x11   :  { %23 = dma.hbm_to_vmem [thread:$0]  %s941_s0, 512, %s18_s19, [#allocation3], %s790_s28, %s790_s28, %s791_s29  }
  0x12   :  { %785 = dma.done.wait [#allocation3], 512  }
  0x13   :  { %786 = vsyncadd [#allocation3], 4294966784  ;;  %v92_v0 = vld [vmem:[%s942_s1] sm:$0xff]  ;;  %v93_v1 = vld [vmem:[%s942_s1 + $0x8] sm:$0xff]  ;;  %vm96_vm0 = vcmask 261120   ;;  %v792_v25 = vmov 0.0|0.0   ;;  %v39_v36 = vlaneseq }
  0x14   :  { %v94_v2 = vld [vmem:[%s942_s1 + $0x10] sm:$0xff]  ;;  %v696_v3 = vpack.c.bf16 %v93_v1, %v92_v0  ;;  %v95_v4 = vld [vmem:[%s942_s1 + $0x18] sm:$0xff]  ;;  %v583_v5 = vld [vmem:[%s942_s1 + $0x20] sm:$0xff]  ;;  %vm793_vm1 = vmmov 0   ;;  %v794_v28 = vmov 0.0   ;;  %vm451_vm8 = vcmask 523264  }
  0x15   :  { %v584_v6 = vld [vmem:[%s942_s1 + $0x28] sm:$0xff]  ;;  %v700_v7 = vpack.c.bf16 %v95_v4, %v94_v2  ;;  %v35_v9 = vld [vmem:[#allocation2] sm:$0xff]  ;;  %v585_v10 = vld [vmem:[%s942_s1 + $0x30] sm:$0xff]  ;;  %v40_v37 = vshrl.u32 %v39_v36, 7  ;;  %vm487_vm9 = vcmask 1041409   ;;  %s795_s21 = smov [#allocation5]  }
  0x16   :  { %v704_v8 = vpack.c.bf16 %v584_v6, %v583_v5  ;;  %697 = vmatprep.subr.bf16.mxu0 %v696_v3  ;;  %643 = vmatprep.mubr.msk.f32.mxu0 %vm96_vm0, %v35_v9  ;;  %v586_v11 = vld [vmem:[%s942_s1 + $0x38] sm:$0xff]  ;;  %v591_v12 = vld [vmem:[%s942_s1 + $0x40] sm:$0xff]  ;;  %v592_v13 = vld [vmem:[%s942_s1 + $0x48] sm:$0xff]  ;;  %s570_s22 = sshll.u32 %s795_s21, 4  ;;  %vm562_vm10 = vcmask 254976   ;;  %s571_s22 = int_to_ptr.vmem [resolvable:$true] %s570_s22 }
  0x17   :  { %699 = vmatpush3.bf16.msra.mxu0 %v696_v3  ;;  %v708_v14 = vpack.c.bf16 %v586_v11, %v585_v10  ;;  %v712_v15 = vpack.c.bf16 %v592_v13, %v591_v12  ;;  %657 = vmatprep.mubr.msk.f32.mxu1 %vm96_vm0, %v35_v9  ;;  %v593_v16 = vld [vmem:[%s942_s1 + $0x50] sm:$0xff]  ;;  %v594_v17 = vld [vmem:[%s942_s1 + $0x58] sm:$0xff]  ;;  %v36_v18 = vld [vmem:[#allocation2 + $0x8] sm:$0xff]  ;;  %v42_v38 = vadd.s32 16, %v40_v37  ;;  %vm198_vm2 = vcmp.lt.s32.totalorder %v40_v37, 1  ;;  %s763_s23 = scalar_lea.vmem %s571_s22, 32  ;;  %p768_p9 = scmp.lt.s32.totalorder %s571_s22, %s571_s22 }
  0x18   :  { %705 = vmatprep.subr.bf16.mxu1 %v704_v8  ;;  %701 = vmatprep.subr.bf16.mxu0 %v700_v7  ;;  %v37_v19 = vld [vmem:[#allocation2 + $0x10] sm:$0xff]  ;;  %v716_v20 = vpack.c.bf16 %v594_v17, %v593_v16  ;;  %v38_v21 = vld [vmem:[#allocation2 + $0x18] sm:$0xff]  ;;  %v470_v22 = vld [vmem:[%s944_s3] sm:$0xff]  ;;  %v48_v42 = vand.u32 15, %v40_v37  ;;  %v43_v49 = vadd.s32 24, %v40_v37  ;;  %v41_v55 = vadd.s32 8, %v40_v37  ;;  %p764_p8 = scmp.ne.s32.totalorder %s571_s22, %s763_s23  ;;  %p769_p10 = scmp.lt.s32.totalorder %s763_s23, %s763_s23 }
  0x19   :  { %707 = vmatpush3.bf16.msra.mxu1 %v704_v8  ;;  %v471_v23 = vld [vmem:[%s944_s3 + $0x8] sm:$0xff]  ;;  %v472_v24 = vld [vmem:[%s944_s3 + $0x10] sm:$0xff]  ;;  %v473_v27 = vld [vmem:[%s944_s3 + $0x18] sm:$0xff]  ;;  %v62_v45 = vand.u32 15, %v42_v38  ;;  %vm411_vm5 = vcmp.lt.s32.totalorder %v40_v37, 7 }
  0x1a   :  { %709 = vmatprep.subr.bf16.mxu1 %v708_v14  ;;  %v721_v26 = vpack.c.bf16 %v471_v23, %v470_v22  ;;  %v724_v29 = vpack.c.bf16 %v473_v27, %v472_v24  ;;  %v474_v30 = vld [vmem:[%s944_s3 + $0x20] sm:$0xff]  ;;  %v475_v31 = vld [vmem:[%s944_s3 + $0x28] sm:$0xff]  ;;  %v476_v33 = vld [vmem:[%s944_s3 + $0x30] sm:$0xff]  ;;  %vm203_vm3 = vcmp.lt.s32.totalorder %v48_v42, 1  ;;  %v69_v62 = vand.u32 15, %v43_v49  ;;  %p770_p11 = por %p769_p10, %p768_p9 }
  0x1b   :  { %703 = vmatpush3.bf16.msra.mxu0 %v700_v7  ;;  %v727_v32 = vpack.c.bf16 %v475_v31, %v474_v30  ;;  %v477_v34 = vld [vmem:[%s944_s3 + $0x38] sm:$0xff]  ;;  %vm205_vm4 = vcmp.lt.s32.totalorder %v62_v45, 1  ;;  %v55_v6 = vand.u32 15, %v41_v55  ;;  %v599_v10 = vld [vmem:[%s943_s2] ss:$0 sm:$0xff] }
  0x1c   :  { %713 = vmatprep.subr.bf16.mxu0 %v712_v15  ;;  %v730_v35 = vpack.c.bf16 %v477_v34, %v476_v33  ;;  %vm419_vm6 = vcmp.ge.s32.totalorder %v69_v62, 15  ;;  %v600_v49 = vld [vmem:[%s945_s4] ss:$0 sm:$0xff]  ;;  %p771_p12 = pnand %p770_p11, %p764_p8 }
  0x1d   :  { %711 = vmatpush3.bf16.msra.mxu1 %v708_v14  ;;  %vm417_vm7 = vcmp.ge.s32.totalorder %v55_v6, 15 }
  0x1e   :  { %644 = vmatmul.mubr.msk.f32.vlgmr.msra.gmra.mrb[0].mxu0 %vm96_vm0, %v36_v18  ;;  %720 = vmatprep.subr.bf16.mxu1 %v792_v25 }
  0x1f   :  { %715 = vmatpush3.bf16.msra.mxu0 %v712_v15  ;;  %646 = vmatprep.mubr.msk.f32.mxu0 %vm96_vm0, %v37_v19 }
  0x20   :  { %658 = vmatmul.mubr.msk.f32.vlgmr.msra.gmra.mrb[0].mxu1 %vm96_vm0, %v36_v18  ;;  %717 = vmatprep.subr.bf16.mxu0 %v716_v20 }
  0x21   :  { %660 = vmatprep.mubr.msk.f32.mxu1 %vm96_vm0, %v37_v19  ;;  %722 = vmatpush3.bf16.msra.mxu1 %v721_v26 }
  0x22   :  { %647 = vmatmul.mubr.msk.f32.gmra.mrb[2].mxu0 %vm96_vm0, %v38_v21  ;;  %723 = vmatprep.subr.bf16.mxu1 %v792_v25 }
  0x23   :  { %719 = vmatpush3.bf16.msra.mxu0 %v716_v20  ;;  %671 = vmatprep.mubr.msk.f32.mxu0 %vm96_vm0, %v35_v9 }
  0x24   :  { %661 = vmatmul.mubr.msk.f32.gmra.mrb[2].mxu1 %vm96_vm0, %v38_v21 }
  0x25   :  { %693 = vmatprep.mubr.msk.f32.mxu1 %vm793_vm1, %v794_v28  ;;  %725 = vmatpush3.bf16.msra.mxu1 %v724_v29 }
  0x26   :  { %672 = vmatmul.mubr.msk.f32.vlgmr.msra.gmra.mrb[4].mxu0 %vm96_vm0, %v36_v18  ;;  %726 = vmatprep.subr.bf16.mxu1 %v792_v25 }
  0x27   :  { %674 = vmatprep.mubr.msk.f32.mxu0 %vm96_vm0, %v37_v19 }
  0x29   :  { %728 = vmatpush3.bf16.msra.mxu1 %v727_v32 }
  0x2a   :  { %675 = vmatmul.mubr.msk.f32.gmra.mrb[6].mxu0 %vm96_vm0, %v38_v21  ;;  %729 = vmatprep.subr.bf16.mxu1 %v792_v25 }
  0x2d   :  { %731 = vmatpush3.bf16.msra.mxu1 %v730_v35 }
  0xf1   :  { %v645_v39 = vpop.f32.mrb[0].mxu0 }
  0xf2   :  { %v195_v40 = vrot.slane %v645_v39, 7  ;;  %v175_v41 = vpop.f32.mrb[1].mxu0 }
  0xf3   :  { %v194_v43 = vrot.slane %v175_v41, 7  ;;  %v659_v44 = vpop.f32.mrb[0].mxu1 }
  0xf4   :  { %v294_v46 = vpop.f32.mrb[1].mxu1 }
  0xf5   :  { %v648_v47 = vpop.f32.mrb[2].mxu0  ;;  %v201_v48 = vsel %vm198_vm2, %v194_v43, %v195_v40 }
  0xf6   :  { %v197_v50 = vrot.slane %v648_v47, 7  ;;  %v314_v51 = vadd.f32 %v659_v44, %v201_v48  ;;  %v185_v52 = vpop.f32.mrb[3].mxu0 }
  0xf7   :  { %v196_v53 = vrot.slane %v185_v52, 7  ;;  %v662_v54 = vpop.f32.mrb[2].mxu1 }
  0xf8   :  { %v202_v56 = vsel %vm198_vm2, %v197_v50, %v194_v43  ;;  %v304_v57 = vpop.f32.mrb[3].mxu1 }
  0xf9   :  { %v215_v58 = vsel %vm203_vm3, 0.0, %v202_v56  ;;  %v199_v59 = vsel %vm198_vm2, %v196_v53, %v197_v50  ;;  %v673_v60 = vpop.f32.mrb[4].mxu0  ;;  %v200_v61 = vsel %vm198_vm2, %v195_v40, %v196_v53 }
  0xfa   :  { %v313_v63 = vadd.f32 %v294_v46, %v215_v58  ;;  %v316_v0 = vadd.f32 %v662_v54, %v199_v59  ;;  %v408_v1 = vrot.slane %v673_v60, 1  ;;  %v217_v2 = vsel %vm205_vm4, 0.0, %v200_v61  ;;  %v388_v3 = vpop.f32.mrb[5].mxu0 }
  0xfb   :  { %v315_v4 = vadd.f32 %v304_v57, %v217_v2  ;;  %v407_v5 = vrot.slane %v388_v3, 1 }
  0xfd   :  { %v414_v7 = vsel %vm411_vm5, %v407_v5, %v408_v1  ;;  %v676_v8 = vpop.f32.mrb[6].mxu0 }
  0xfe   :  { %v432_v9 = vadd.f32 %v414_v7, %v313_v63  ;;  %v410_v11 = vrot.slane %v676_v8, 1  ;;  %v398_v12 = vpop.f32.mrb[7].mxu0 }
  0xff   :  { %v409_v13 = vrot.slane %v398_v12, 1 }
 0x100   :  { %v415_v14 = vsel %vm411_vm5, %v410_v11, %v407_v5  ;;  %v443_v15 = vadd.f32 %v599_v10, %v432_v9 }
 0x101   :  { %v431_v16 = vsel %vm419_vm6, 0.0, %v415_v14  ;;  %v412_v17 = vsel %vm411_vm5, %v409_v13, %v410_v11  ;;  %v413_v18 = vsel %vm411_vm5, %v408_v1, %v409_v13 }
 0x102   :  { %v435_v19 = vadd.f32 %v431_v16, %v316_v0  ;;  %v429_v20 = vsel %vm417_vm7, 0.0, %v413_v18  ;;  %v434_v21 = vadd.f32 %v412_v17, %v315_v4  ;;  %v447_v25 = vmax.f32 %v443_v15, 0.0 }
 0x103   :  { %v433_v22 = vadd.f32 %v429_v20, %v314_v51 }
 0x104   :  { %v446_v23 = vadd.f32 %v599_v10, %v435_v19  ;;  %v445_v24 = vadd.f32 %v599_v10, %v434_v21  ;;  %v452_v32 = vsel %vm451_vm8, %v447_v25, -inf }
 0x105   :  { %v444_v26 = vadd.f32 %v599_v10, %v433_v22 }
 0x106   :  { %v450_v27 = vmax.f32 %v446_v23, 0.0  ;;  %v449_v28 = vmax.f32 %v445_v24, 0.0 }
 0x107   :  { %v448_v29 = vmax.f32 %v444_v26, 0.0 }
 0x108   :  { %v461_v30 = vsel %vm451_vm8, %v449_v28, -inf  ;;  %v462_v31 = vsel %vm451_vm8, %v450_v27, -inf }
 0x109   :  { %v453_v33 = vsel %vm451_vm8, %v448_v29, -inf  ;;  %v463_v34 = vmax.f32 %v461_v30, %v462_v31 }
 0x10a   :  { %v454_v35 = vmax.f32 %v452_v32, %v453_v33 }
 0x10b   :  { %v464_v36 = vrot.slane %v463_v34, 4 }
 0x10c   :  { %v455_v37 = vrot.slane %v454_v35, 4 }
 0x10d   :  { %v465_v38 = vmax.f32 %v463_v34, %v464_v36 }
 0x10e   :  { %v456_v39 = vmax.f32 %v454_v35, %v455_v37 }
 0x10f   :  { %v466_v40 = vrot.slane %v465_v38, 2 }
 0x110   :  { %v457_v41 = vrot.slane %v456_v39, 2 }
 0x111   :  { %v467_v42 = vmax.f32 %v465_v38, %v466_v40 }
 0x112   :  { %v458_v43 = vmax.f32 %v456_v39, %v457_v41 }
 0x113   :  { %v468_v44 = vrot.slane %v467_v42, 1 }
 0x114   :  { %v459_v45 = vrot.slane %v458_v43, 1 }
 0x115   :  { %v469_v46 = vmax.f32 %v467_v42, %v468_v44 }
 0x116   :  { %v460_v47 = vmax.f32 %v458_v43, %v459_v45 }
 0x118   :  { %v488_v48 = vsel %vm487_vm9, %v469_v46, %v460_v47 }
 0x119   :  { %694 = vmatmul.mubr.msk.f32.vlgmr.msra.gmra.mrb[4].mxu1 %vm451_vm8, %v488_v48 }
 0x1ec   :  { %v557_v50 = vpop.f32.mrb[4].mxu1 }
 0x1ed   :  { %v558_v51 = vadd.f32 %v600_v49, %v557_v50  ;;  %v695_v52 = vpop.f32.mrb[5].mxu1 }
 0x1ef   :  { %739 = vtanh.f32 %v558_v51 }
 0x1f9   :  { %v740_v53 = vpop.eup %739 }
 0x1fa   :  { %563 = vst.msk [vmem:[#allocation5] sm:$0x3] %vm562_vm10, %v740_v53 }
 0x1fb   :  { %774 = shalt.err (!%p771_p12)
}
 0x1fc   :  { %s775_s4 = scalar_lea.hbm %s946_s5, 32 }
 0x1fd   :  { %p776_p13 = scmp.ne.s32.totalorder %s946_s5, %s775_s4  ;;  %p779_p0 = scmp.lt.u32.totalorder %s775_s4, %s946_s5 }
 0x1ff   :  { %p781_p1 = pnand %p779_p0, %p776_p13 }
 0x201   :  { %784 = shalt.err (!%p781_p1)
}
 0x202   :  { %573 = dma.vmem_to_hbm [thread:$0]  %s571_s22, 32, %s946_s5, [#allocation4]  }
 0x203   :  { %787 = dma.done.wait [#allocation4], 32  }
 0x204   :  { %788 = vsyncadd [#allocation4], 4294967264 }
 0x205   :  { %577 = vsyncpa [#allocation3], 1 }
 0x206   :  { %578 = vsyncpa [#allocation4], 1 }

</bundles_post_ra>
